<compile_context>
chip_gen: v7x
topology: tpu7x:2x2x1
jax: 0.10.0
libtpu: 0.0.40
codegen_flags: <defaults>
</compile_context>

<pallas_src>
import functools

import jax
import jax.numpy as jnp
from jax.experimental import pallas as pl
from jax.experimental.pallas import tpu as pltpu


def _random_transform_kernel(x_ref, g_ref, out_ref, wy_ref, wxt_ref,
                             *, C, H, W, T, unroll):
    """One grid step: BB batch elements, written directly in NCHW layout.

    x_ref  : (BB, C, H, W)  input images
    g_ref  : (BB, 2, T)     row 0 = gy (normalized y coords), row 1 = gx
    out_ref: (BB, C, T, T)  output (same layout as the PyTorch module)
    wy_ref : (BB, T, H)     scratch: y bilinear weights, (T, H) oriented
    wxt_ref: (BB, W, T)     scratch: x bilinear weights, transposed (W, T)
    """
    BB = x_ref.shape[0]
    compute_dtype = wy_ref.dtype

    # ---- bilinear weights for grid_sample(align_corners=True, zeros padding)
    # Built once per grid step, vectorized over the whole batch block.
    # Weight construction (floor/compare/select) stays in f32 VPU ops; only
    # the final weights are cast to the MXU compute dtype.
    g = g_ref[...].astype(jnp.float32)                    # (BB, 2, T)
    gy, gx = g[:, 0, :], g[:, 1, :]                       # (BB, T)

    # y weights built directly in (T, H) orientation (LHS of the 2nd matmul)
    # so no transpose is ever materialized.
    pos_y = (gy + 1.0) * 0.5 * (H - 1)                    # (BB, T)
    y0 = jnp.floor(pos_y)
    fy = pos_y - y0
    y0i = y0.astype(jnp.int32)
    row = jax.lax.broadcasted_iota(jnp.int32, (1, T, H), 2)   # source row idx
    # zero padding: a neighbor outside [0, H-1] simply never matches `row`
    wy_ref[...] = (jnp.where(row == y0i[:, :, None], 1.0 - fy[:, :, None], 0.0)
                   + jnp.where(row == y0i[:, :, None] + 1, fy[:, :, None], 0.0)
                   ).astype(compute_dtype)

    # x weights in transposed (W, T) orientation (RHS of the 1st matmul).
    pos_x = (gx + 1.0) * 0.5 * (W - 1)                    # (BB, T)
    x0 = jnp.floor(pos_x)
    fx = pos_x - x0
    x0i = x0.astype(jnp.int32)
    col = jax.lax.broadcasted_iota(jnp.int32, (1, W, T), 1)   # source col idx
    wxt_ref[...] = (jnp.where(col == x0i[:, None, :], 1.0 - fx[:, None, :], 0.0)
                    + jnp.where(col == x0i[:, None, :] + 1, fx[:, None, :], 0.0)
                    ).astype(compute_dtype)

    # ---- per-batch-element sampling: out[b, c] = Wy[b] @ x[b, c] @ Wx[b]^T
    def body(b, carry):
        wy = wy_ref[b]                                    # (T, H)
        wxt = wxt_ref[b]                                  # (W, T)
        for c in range(C):                                # small static channel loop
            xc = x_ref[b, c].astype(compute_dtype)                       # (H, W)
            t1 = jnp.dot(xc, wxt, preferred_element_type=jnp.float32)    # (H, T)
            out_c = jnp.dot(wy, t1.astype(compute_dtype),
                            preferred_element_type=jnp.float32)          # (T, T)
            out_ref[b, c] = out_c.astype(out_ref.dtype)
        return carry

    # Bounded unroll: keeps LLO scheduling visibility without letting the
    # per-iteration intermediates' live ranges grow with BB.
    jax.lax.fori_loop(0, BB, body, 0, unroll=unroll)


def _round_up(n, m):
    return -(-n // m) * m


def _pick_batch_block(B, per_b_io, per_b_scr, fixed_scr, budget,
                      min_steps, even_steps):
    """Largest divisor of B whose (double-buffered) footprint fits `budget`,
    preferring >= min_steps grid steps for pipeline overlap (as long as each
    block stays >= ~2 MiB) and, on 2-TC chips, an even number of steps."""
    divisors = [d for d in range(1, B + 1) if B % d == 0]

    def cost(d):
        return 2 * d * per_b_io + d * per_b_scr + fixed_scr

    fitting = [d for d in divisors if cost(d) <= budget] or [1]
    bb = max(fitting)

    # Prefer enough steps for software pipelining, but never shrink blocks
    # below a few MiB (per-step overhead would dominate a mem-bound kernel).
    preferred = [d for d in fitting
                 if B // d >= min_steps and d * per_b_io >= 2 * 1024 * 1024]
    if B // bb < min_steps and preferred:
        bb = max(preferred)

    # v7x-class (2 TensorCores): keep the two cores balanced.
    if even_steps and (B // bb) % 2 != 0:
        even = [d for d in fitting if (B // d) % 2 == 0 and d <= bb]
        if not even:
            even = [d for d in fitting if (B // d) % 2 == 0]
        if even:
            bb = max(even)
    return bb


@functools.partial(jax.jit, static_argnames=(
    "source_size", "target_size", "shift", "fliplr", "flipud"))
def random_transform(x, randgen, *, source_size, target_size,
                     shift=8, fliplr=True, flipud=False):
    """Pallas equivalent of RandomTransform.forward(x, randgen)."""
    # TODO(synk): only mode='bilinear' (the module default) is implemented;
    # mode='nearest' would need a different in-kernel weight construction.
    B, C, H, W = x.shape
    assert H == source_size and W == source_size
    T = target_size
    dtype = x.dtype
    compute_dtype = jnp.bfloat16 if dtype == jnp.bfloat16 else jnp.float32

    # ---- glue: separable shifted/flipped grid coords (= random_crop_grid) ----
    k = float(target_size) / float(source_size)
    lin = jnp.linspace(-1.0, k, T, dtype=jnp.float32)                    # (T,)
    delta = jnp.linspace(0.0, 1.0, source_size, dtype=jnp.float32)[shift]
    x_shift = (randgen[:, 0].astype(jnp.float32) - 0.5) * 2.0 * delta    # (B,)
    y_shift = (randgen[:, 1].astype(jnp.float32) - 0.5) * 2.0 * delta    # (B,)
    gx = lin[None, :] + x_shift[:, None]                                 # (B, T)
    gy = lin[None, :] + y_shift[:, None]                                 # (B, T)
    if fliplr:
        gx = jnp.where((randgen[:, 2] > 0.5)[:, None], -gx, gx)
    if flipud:
        gy = jnp.where((randgen[:, 3] > 0.5)[:, None], -gy, gy)
    g = jnp.stack([gy, gx], axis=1).astype(jnp.float32)                  # (B, 2, T)

    # ---- generation-aware VMEM budgets -------------------------------------
    try:
        vmem_cap = int(pltpu.get_tpu_info().vmem_capacity_bytes)
    except Exception:
        vmem_cap = 64 * 1024 * 1024          # conservative fallback
    if vmem_cap <= 96 * 1024 * 1024:         # v7x-class: 64 MiB VMEM, 2 TCs
        vmem_limit = 40 * 1024 * 1024
        min_steps = 8                        # >= 4 steps per TensorCore
        even_steps = True
    else:                                    # v5e / v6e: 128 MiB VMEM, 1 TC
        vmem_limit = 80 * 1024 * 1024
        min_steps = 4
        even_steps = False
    budget = vmem_limit - 4 * 1024 * 1024    # headroom for internal scratch

    # ---- honest per-batch-element VMEM accounting (incl. (8,128) padding) ---
    item = dtype.itemsize
    cbytes = jnp.dtype(compute_dtype).itemsize
    x_blk = C * _round_up(H, 8) * _round_up(W, 128) * item
    g_blk = _round_up(2, 8) * _round_up(T, 128) * 4
    o_blk = C * _round_up(T, 8) * _round_up(T, 128) * item
    per_b_io = x_blk + g_blk + o_blk
    # hoisted weight scratch (+ f32 build temporaries), lives the whole step
    w_pad = (_round_up(T, 8) * _round_up(H, 128)
             + _round_up(W, 8) * _round_up(T, 128))
    per_b_scr = w_pad * (cbytes + 4)
    # per-unrolled-iteration intermediates (t1, out_c, xc)
    unroll = 2
    per_iter = ((_round_up(H, 8) * _round_up(T, 128)
                 + _round_up(T, 8) * _round_up(T, 128)) * 4 * 2
                + _round_up(H, 8) * _round_up(W, 128) * cbytes)
    fixed_scr = unroll * per_iter

    BB = _pick_batch_block(B, per_b_io, per_b_scr, fixed_scr, budget,
                           min_steps, even_steps)
    nb = B // BB
    unroll = unroll if BB >= unroll else 1

    kernel = functools.partial(_random_transform_kernel,
                               C=C, H=H, W=W, T=T, unroll=unroll)

    cost = pl.CostEstimate(
        flops=2 * B * C * H * T * (W + T),
        transcendentals=0,
        bytes_accessed=(B * C * H * W + B * C * T * T) * item + B * 2 * T * 4,
    )

    return pl.pallas_call(
        kernel,
        out_shape=jax.ShapeDtypeStruct((B, C, T, T), dtype),
        grid_spec=pltpu.PrefetchScalarGridSpec(
            num_scalar_prefetch=0,
            grid=(nb,),
            in_specs=[
                pl.BlockSpec((BB, C, H, W), lambda i: (i, 0, 0, 0)),
                pl.BlockSpec((BB, 2, T), lambda i: (i, 0, 0)),
            ],
            out_specs=pl.BlockSpec((BB, C, T, T), lambda i: (i, 0, 0, 0)),
            scratch_shapes=[
                pltpu.VMEM((BB, T, H), compute_dtype),   # Wy, (T,H) oriented
                pltpu.VMEM((BB, W, T), compute_dtype),   # Wx^T
            ],
        ),
        compiler_params=pltpu.CompilerParams(
            dimension_semantics=("parallel",),
            vmem_limit_bytes=vmem_limit,
        ),
        cost_estimate=cost,
    )(x, g)


def _reference(x, randgen, *, source_size, target_size, shift, fliplr, flipud):
    """Pure-JAX reference grid_sample (gather form) for correctness check."""
    B, C, H, W = x.shape
    T = target_size
    k = float(target_size) / float(source_size)
    lin = jnp.linspace(-1.0, k, T, dtype=jnp.float32)
    delta = jnp.linspace(0.0, 1.0, source_size, dtype=jnp.float32)[shift]
    gx = lin[None, :] + ((randgen[:, 0] - 0.5) * 2.0 * delta)[:, None]
    gy = lin[None, :] + ((randgen[:, 1] - 0.5) * 2.0 * delta)[:, None]
    if fliplr:
        gx = jnp.where((randgen[:, 2] > 0.5)[:, None], -gx, gx)
    if flipud:
        gy = jnp.where((randgen[:, 3] > 0.5)[:, None], -gy, gy)

    def sample1(xb, gyb, gxb):  # xb (C,H,W), gyb (T,), gxb (T,)
        ix = (gxb + 1.0) * 0.5 * (W - 1)
        iy = (gyb + 1.0) * 0.5 * (H - 1)
        x0 = jnp.floor(ix); y0 = jnp.floor(iy)
        fx = ix - x0; fy = iy - y0
        x0i = x0.astype(jnp.int32); y0i = y0.astype(jnp.int32)

        def gather(yi, xi):
            valid = ((yi >= 0)[:, None] & (yi < H)[:, None]
                     & (xi >= 0)[None, :] & (xi < W)[None, :])
            yc = jnp.clip(yi, 0, H - 1)
            xc = jnp.clip(xi, 0, W - 1)
            v = xb[:, yc[:, None], xc[None, :]]          # (C, T, T)
            return jnp.where(valid[None], v, 0.0)

        w00 = (1 - fy)[:, None] * (1 - fx)[None, :]
        w01 = (1 - fy)[:, None] * fx[None, :]
        w10 = fy[:, None] * (1 - fx)[None, :]
        w11 = fy[:, None] * fx[None, :]
        return (w00[None] * gather(y0i, x0i) + w01[None] * gather(y0i, x0i + 1)
                + w10[None] * gather(y0i + 1, x0i) + w11[None] * gather(y0i + 1, x0i + 1))

    return jax.vmap(sample1)(x.astype(jnp.float32), gy, gx).astype(x.dtype)


if __name__ == "__main__":
    B, C, S, T, SHIFT = 2, 4, 16, 16, 4
    key = jax.random.PRNGKey(0)
    kx, kr = jax.random.split(key)
    x = jax.random.normal(kx, (B, C, S, S), dtype=jnp.float32)
    randgen = jax.random.uniform(kr, (B, 4), dtype=jnp.float32)

    # f32 path (tight tolerance)
    out = random_transform(x, randgen, source_size=S, target_size=T,
                           shift=SHIFT, fliplr=True, flipud=False)
    out = jax.block_until_ready(out)
    ref = _reference(x, randgen, source_size=S, target_size=T,
                     shift=SHIFT, fliplr=True, flipud=False)
    assert out.shape == (B, C, T, T)
    assert jnp.max(jnp.abs(out - ref)) < 1e-4

    # bf16 path (loose tolerance: bf16 MXU inputs, f32 accumulation)
    xb16 = x.astype(jnp.bfloat16)
    out_bf = random_transform(xb16, randgen, source_size=S, target_size=T,
                              shift=SHIFT, fliplr=True, flipud=False)
    out_bf = jax.block_until_ready(out_bf)
    ref_bf = _reference(xb16, randgen, source_size=S, target_size=T,
                        shift=SHIFT, fliplr=True, flipud=False)
    assert out_bf.shape == (B, C, T, T)
    assert jnp.max(jnp.abs(out_bf.astype(jnp.float32)
                           - ref_bf.astype(jnp.float32))) < 0.25

    print("KERNEL_OK")
</pallas_src>

<mosaic_0001>
module attributes {stable_mosaic.version = 11 : i64} {
  func.func @_random_transform_kernel(%arg0: i32, %arg1: memref<1x4x16x16xf32, #tpu.memory_space<vmem>>, %arg2: memref<1x2x16xf32, #tpu.memory_space<vmem>>, %arg3: memref<1x4x16x16xf32, #tpu.memory_space<vmem>>, %arg4: memref<1x16x16xf32, #tpu.memory_space<vmem>>, %arg5: memref<1x16x16xf32, #tpu.memory_space<vmem>>) attributes {dimension_semantics = [#tpu.dimension_semantics<parallel>], iteration_bounds = array<i64: 2>, scalar_prefetch = 0 : i64, scratch_operands = 2 : i64, tpu.core_type = #tpu.core_type<tc>, window_params = [{transform_indices = @transform_0, window_bounds = array<i64: 1, 4, 16, 16>}, {transform_indices = @transform_1, window_bounds = array<i64: 1, 2, 16>}, {transform_indices = @transform_2, window_bounds = array<i64: 1, 4, 16, 16>}]} {
    %c0 = arith.constant 0 : index
    %c0_0 = arith.constant 0 : index
    %c0_1 = arith.constant 0 : index
    %0 = vector.load %arg2[%c0, %c0_0, %c0_1] : memref<1x2x16xf32, #tpu.memory_space<vmem>>, vector<1x2x16xf32>
    %1 = vector.extract_strided_slice %0 {offsets = [0, 0, 0], sizes = [1, 1, 16], strides = [1, 1, 1]} : vector<1x2x16xf32> to vector<1x1x16xf32>
    %2 = vector.shape_cast %1 : vector<1x1x16xf32> to vector<1x16xf32>
    %3 = vector.extract_strided_slice %0 {offsets = [0, 1, 0], sizes = [1, 1, 16], strides = [1, 1, 1]} : vector<1x2x16xf32> to vector<1x1x16xf32>
    %4 = vector.shape_cast %3 : vector<1x1x16xf32> to vector<1x16xf32>
    %cst = arith.constant 1.000000e+00 : f32
    %5 = vector.broadcast %cst : f32 to vector<1x16xf32>
    %6 = arith.addf %2, %5 : vector<1x16xf32>
    %cst_2 = arith.constant 5.000000e-01 : f32
    %7 = vector.broadcast %cst_2 : f32 to vector<1x16xf32>
    %8 = arith.mulf %6, %7 : vector<1x16xf32>
    %cst_3 = arith.constant 1.500000e+01 : f32
    %9 = vector.broadcast %cst_3 : f32 to vector<1x16xf32>
    %10 = arith.mulf %8, %9 : vector<1x16xf32>
    %11 = math.floor %10 : vector<1x16xf32>
    %12 = arith.subf %10, %11 : vector<1x16xf32>
    %13 = arith.fptosi %11 : vector<1x16xf32> to vector<1x16xi32>
    %14 = tpu.iota {dimensions = array<i32: 2>} : vector<1x16x16xi32>
    %15 = vector.shape_cast %13 : vector<1x16xi32> to vector<1x16x1xi32>
    %16 = vector.broadcast %15 : vector<1x16x1xi32> to vector<1x16x16xi32>
    %17 = arith.cmpi eq, %14, %16 : vector<1x16x16xi32>
    %18 = vector.shape_cast %12 : vector<1x16xf32> to vector<1x16x1xf32>
    %cst_4 = arith.constant 1.000000e+00 : f32
    %19 = vector.broadcast %cst_4 : f32 to vector<1x16x1xf32>
    %20 = arith.subf %19, %18 : vector<1x16x1xf32>
    %cst_5 = arith.constant 0.000000e+00 : f32
    %21 = vector.shape_cast %20 : vector<1x16x1xf32> to vector<1x16x1xf32>
    %22 = vector.broadcast %21 : vector<1x16x1xf32> to vector<1x16x16xf32>
    %23 = vector.broadcast %cst_5 : f32 to vector<1x16x16xf32>
    %24 = arith.select %17, %22, %23 : vector<1x16x16xi1>, vector<1x16x16xf32>
    %25 = vector.shape_cast %13 : vector<1x16xi32> to vector<1x16x1xi32>
    %c1_i32 = arith.constant 1 : i32
    %26 = vector.broadcast %c1_i32 : i32 to vector<1x16x1xi32>
    %27 = arith.addi %25, %26 : vector<1x16x1xi32>
    %28 = vector.broadcast %27 : vector<1x16x1xi32> to vector<1x16x16xi32>
    %29 = arith.cmpi eq, %14, %28 : vector<1x16x16xi32>
    %30 = vector.shape_cast %12 : vector<1x16xf32> to vector<1x16x1xf32>
    %cst_6 = arith.constant 0.000000e+00 : f32
    %31 = vector.shape_cast %30 : vector<1x16x1xf32> to vector<1x16x1xf32>
    %32 = vector.broadcast %31 : vector<1x16x1xf32> to vector<1x16x16xf32>
    %33 = vector.broadcast %cst_6 : f32 to vector<1x16x16xf32>
    %34 = arith.select %29, %32, %33 : vector<1x16x16xi1>, vector<1x16x16xf32>
    %35 = arith.addf %24, %34 : vector<1x16x16xf32>
    %c0_7 = arith.constant 0 : index
    %c0_8 = arith.constant 0 : index
    %c0_9 = arith.constant 0 : index
    %36 = vector.load %arg4[%c0_7, %c0_8, %c0_9] : memref<1x16x16xf32, #tpu.memory_space<vmem>>, vector<1x16x16xf32>
    tpu.vector_store %arg4[%c0_7, %c0_8, %c0_9], %35 {strides = array<i32>} : memref<1x16x16xf32, #tpu.memory_space<vmem>>, vector<1x16x16xf32>,
    %cst_10 = arith.constant 1.000000e+00 : f32
    %37 = vector.broadcast %cst_10 : f32 to vector<1x16xf32>
    %38 = arith.addf %4, %37 : vector<1x16xf32>
    %cst_11 = arith.constant 5.000000e-01 : f32
    %39 = vector.broadcast %cst_11 : f32 to vector<1x16xf32>
    %40 = arith.mulf %38, %39 : vector<1x16xf32>
    %cst_12 = arith.constant 1.500000e+01 : f32
    %41 = vector.broadcast %cst_12 : f32 to vector<1x16xf32>
    %42 = arith.mulf %40, %41 : vector<1x16xf32>
    %43 = math.floor %42 : vector<1x16xf32>
    %44 = arith.subf %42, %43 : vector<1x16xf32>
    %45 = arith.fptosi %43 : vector<1x16xf32> to vector<1x16xi32>
    %46 = tpu.iota {dimensions = array<i32: 1>} : vector<1x16x16xi32>
    %47 = vector.shape_cast %45 : vector<1x16xi32> to vector<1x1x16xi32>
    %48 = vector.broadcast %47 : vector<1x1x16xi32> to vector<1x16x16xi32>
    %49 = arith.cmpi eq, %46, %48 : vector<1x16x16xi32>
    %50 = vector.shape_cast %44 : vector<1x16xf32> to vector<1x1x16xf32>
    %cst_13 = arith.constant 1.000000e+00 : f32
    %51 = vector.broadcast %cst_13 : f32 to vector<1x1x16xf32>
    %52 = arith.subf %51, %50 : vector<1x1x16xf32>
    %cst_14 = arith.constant 0.000000e+00 : f32
    %53 = vector.shape_cast %52 : vector<1x1x16xf32> to vector<1x1x16xf32>
    %54 = vector.broadcast %53 : vector<1x1x16xf32> to vector<1x16x16xf32>
    %55 = vector.broadcast %cst_14 : f32 to vector<1x16x16xf32>
    %56 = arith.select %49, %54, %55 : vector<1x16x16xi1>, vector<1x16x16xf32>
    %57 = vector.shape_cast %45 : vector<1x16xi32> to vector<1x1x16xi32>
    %c1_i32_15 = arith.constant 1 : i32
    %58 = vector.broadcast %c1_i32_15 : i32 to vector<1x1x16xi32>
    %59 = arith.addi %57, %58 : vector<1x1x16xi32>
    %60 = vector.broadcast %59 : vector<1x1x16xi32> to vector<1x16x16xi32>
    %61 = arith.cmpi eq, %46, %60 : vector<1x16x16xi32>
    %62 = vector.shape_cast %44 : vector<1x16xf32> to vector<1x1x16xf32>
    %cst_16 = arith.constant 0.000000e+00 : f32
    %63 = vector.shape_cast %62 : vector<1x1x16xf32> to vector<1x1x16xf32>
    %64 = vector.broadcast %63 : vector<1x1x16xf32> to vector<1x16x16xf32>
    %65 = vector.broadcast %cst_16 : f32 to vector<1x16x16xf32>
    %66 = arith.select %61, %64, %65 : vector<1x16x16xi1>, vector<1x16x16xf32>
    %67 = arith.addf %56, %66 : vector<1x16x16xf32>
    %c0_17 = arith.constant 0 : index
    %c0_18 = arith.constant 0 : index
    %c0_19 = arith.constant 0 : index
    %68 = vector.load %arg5[%c0_17, %c0_18, %c0_19] : memref<1x16x16xf32, #tpu.memory_space<vmem>>, vector<1x16x16xf32>
    tpu.vector_store %arg5[%c0_17, %c0_18, %c0_19], %67 {strides = array<i32>} : memref<1x16x16xf32, #tpu.memory_space<vmem>>, vector<1x16x16xf32>,
    %c0_i32 = arith.constant 0 : i32
    %69 = arith.index_cast %c0_i32 : i32 to index
    %c0_20 = arith.constant 0 : index
    %c0_21 = arith.constant 0 : index
    %70 = vector.load %arg4[%69, %c0_20, %c0_21] : memref<1x16x16xf32, #tpu.memory_space<vmem>>, vector<1x16x16xf32>
    %71 = vector.shape_cast %70 : vector<1x16x16xf32> to vector<16x16xf32>
    %72 = arith.index_cast %c0_i32 : i32 to index
    %c0_22 = arith.constant 0 : index
    %c0_23 = arith.constant 0 : index
    %73 = vector.load %arg5[%72, %c0_22, %c0_23] : memref<1x16x16xf32, #tpu.memory_space<vmem>>, vector<1x16x16xf32>
    %74 = vector.shape_cast %73 : vector<1x16x16xf32> to vector<16x16xf32>
    %75 = arith.index_cast %c0_i32 : i32 to index
    %c0_24 = arith.constant 0 : index
    %c0_25 = arith.constant 0 : index
    %c0_26 = arith.constant 0 : index
    %76 = vector.load %arg1[%75, %c0_24, %c0_25, %c0_26] : memref<1x4x16x16xf32, #tpu.memory_space<vmem>>, vector<1x1x16x16xf32>
    %77 = vector.shape_cast %76 : vector<1x1x16x16xf32> to vector<16x16xf32>
    %cst_27 = arith.constant dense<0.000000e+00> : vector<16x16xf32>
    %78 = tpu.matmul %77, %74, %cst_27 {dimension_numbers = #tpu.dot_dimension_numbers<[1], [0], [0], [1], [0, 0, 1, 1], [], []>} : vector<16x16xf32>, vector<16x16xf32>, vector<16x16xf32> -> vector<16x16xf32>
    %cst_28 = arith.constant dense<0.000000e+00> : vector<16x16xf32>
    %79 = tpu.matmul %71, %78, %cst_28 {dimension_numbers = #tpu.dot_dimension_numbers<[1], [0], [0], [1], [0, 0, 1, 1], [], []>} : vector<16x16xf32>, vector<16x16xf32>, vector<16x16xf32> -> vector<16x16xf32>
    %80 = arith.index_cast %c0_i32 : i32 to index
    %c0_29 = arith.constant 0 : index
    %c0_30 = arith.constant 0 : index
    %c0_31 = arith.constant 0 : index
    %81 = vector.load %arg3[%80, %c0_29, %c0_30, %c0_31] : memref<1x4x16x16xf32, #tpu.memory_space<vmem>>, vector<1x1x16x16xf32>
    %82 = vector.shape_cast %81 : vector<1x1x16x16xf32> to vector<16x16xf32>
    %83 = vector.shape_cast %79 : vector<16x16xf32> to vector<1x1x16x16xf32>
    tpu.vector_store %arg3[%80, %c0_29, %c0_30, %c0_31], %83 {strides = array<i32>} : memref<1x4x16x16xf32, #tpu.memory_space<vmem>>, vector<1x1x16x16xf32>,
    %84 = arith.index_cast %c0_i32 : i32 to index
    %c1 = arith.constant 1 : index
    %c0_32 = arith.constant 0 : index
    %c0_33 = arith.constant 0 : index
    %85 = vector.load %arg1[%84, %c1, %c0_32, %c0_33] : memref<1x4x16x16xf32, #tpu.memory_space<vmem>>, vector<1x1x16x16xf32>
    %86 = vector.shape_cast %85 : vector<1x1x16x16xf32> to vector<16x16xf32>
    %cst_34 = arith.constant dense<0.000000e+00> : vector<16x16xf32>
    %87 = tpu.matmul %86, %74, %cst_34 {dimension_numbers = #tpu.dot_dimension_numbers<[1], [0], [0], [1], [0, 0, 1, 1], [], []>} : vector<16x16xf32>, vector<16x16xf32>, vector<16x16xf32> -> vector<16x16xf32>
    %cst_35 = arith.constant dense<0.000000e+00> : vector<16x16xf32>
    %88 = tpu.matmul %71, %87, %cst_35 {dimension_numbers = #tpu.dot_dimension_numbers<[1], [0], [0], [1], [0, 0, 1, 1], [], []>} : vector<16x16xf32>, vector<16x16xf32>, vector<16x16xf32> -> vector<16x16xf32>
    %89 = arith.index_cast %c0_i32 : i32 to index
    %c1_36 = arith.constant 1 : index
    %c0_37 = arith.constant 0 : index
    %c0_38 = arith.constant 0 : index
    %90 = vector.load %arg3[%89, %c1_36, %c0_37, %c0_38] : memref<1x4x16x16xf32, #tpu.memory_space<vmem>>, vector<1x1x16x16xf32>
    %91 = vector.shape_cast %90 : vector<1x1x16x16xf32> to vector<16x16xf32>
    %92 = vector.shape_cast %88 : vector<16x16xf32> to vector<1x1x16x16xf32>
    tpu.vector_store %arg3[%89, %c1_36, %c0_37, %c0_38], %92 {strides = array<i32>} : memref<1x4x16x16xf32, #tpu.memory_space<vmem>>, vector<1x1x16x16xf32>,
    %93 = arith.index_cast %c0_i32 : i32 to index
    %c2 = arith.constant 2 : index
    %c0_39 = arith.constant 0 : index
    %c0_40 = arith.constant 0 : index
    %94 = vector.load %arg1[%93, %c2, %c0_39, %c0_40] : memref<1x4x16x16xf32, #tpu.memory_space<vmem>>, vector<1x1x16x16xf32>
    %95 = vector.shape_cast %94 : vector<1x1x16x16xf32> to vector<16x16xf32>
    %cst_41 = arith.constant dense<0.000000e+00> : vector<16x16xf32>
    %96 = tpu.matmul %95, %74, %cst_41 {dimension_numbers = #tpu.dot_dimension_numbers<[1], [0], [0], [1], [0, 0, 1, 1], [], []>} : vector<16x16xf32>, vector<16x16xf32>, vector<16x16xf32> -> vector<16x16xf32>
    %cst_42 = arith.constant dense<0.000000e+00> : vector<16x16xf32>
    %97 = tpu.matmul %71, %96, %cst_42 {dimension_numbers = #tpu.dot_dimension_numbers<[1], [0], [0], [1], [0, 0, 1, 1], [], []>} : vector<16x16xf32>, vector<16x16xf32>, vector<16x16xf32> -> vector<16x16xf32>
    %98 = arith.index_cast %c0_i32 : i32 to index
    %c2_43 = arith.constant 2 : index
    %c0_44 = arith.constant 0 : index
    %c0_45 = arith.constant 0 : index
    %99 = vector.load %arg3[%98, %c2_43, %c0_44, %c0_45] : memref<1x4x16x16xf32, #tpu.memory_space<vmem>>, vector<1x1x16x16xf32>
    %100 = vector.shape_cast %99 : vector<1x1x16x16xf32> to vector<16x16xf32>
    %101 = vector.shape_cast %97 : vector<16x16xf32> to vector<1x1x16x16xf32>
    tpu.vector_store %arg3[%98, %c2_43, %c0_44, %c0_45], %101 {strides = array<i32>} : memref<1x4x16x16xf32, #tpu.memory_space<vmem>>, vector<1x1x16x16xf32>,
    %102 = arith.index_cast %c0_i32 : i32 to index
    %c3 = arith.constant 3 : index
    %c0_46 = arith.constant 0 : index
    %c0_47 = arith.constant 0 : index
    %103 = vector.load %arg1[%102, %c3, %c0_46, %c0_47] : memref<1x4x16x16xf32, #tpu.memory_space<vmem>>, vector<1x1x16x16xf32>
    %104 = vector.shape_cast %103 : vector<1x1x16x16xf32> to vector<16x16xf32>
    %cst_48 = arith.constant dense<0.000000e+00> : vector<16x16xf32>
    %105 = tpu.matmul %104, %74, %cst_48 {dimension_numbers = #tpu.dot_dimension_numbers<[1], [0], [0], [1], [0, 0, 1, 1], [], []>} : vector<16x16xf32>, vector<16x16xf32>, vector<16x16xf32> -> vector<16x16xf32>
    %cst_49 = arith.constant dense<0.000000e+00> : vector<16x16xf32>
    %106 = tpu.matmul %71, %105, %cst_49 {dimension_numbers = #tpu.dot_dimension_numbers<[1], [0], [0], [1], [0, 0, 1, 1], [], []>} : vector<16x16xf32>, vector<16x16xf32>, vector<16x16xf32> -> vector<16x16xf32>
    %107 = arith.index_cast %c0_i32 : i32 to index
    %c3_50 = arith.constant 3 : index
    %c0_51 = arith.constant 0 : index
    %c0_52 = arith.constant 0 : index
    %108 = vector.load %arg3[%107, %c3_50, %c0_51, %c0_52] : memref<1x4x16x16xf32, #tpu.memory_space<vmem>>, vector<1x1x16x16xf32>
    %109 = vector.shape_cast %108 : vector<1x1x16x16xf32> to vector<16x16xf32>
    %110 = vector.shape_cast %106 : vector<16x16xf32> to vector<1x1x16x16xf32>
    tpu.vector_store %arg3[%107, %c3_50, %c0_51, %c0_52], %110 {strides = array<i32>} : memref<1x4x16x16xf32, #tpu.memory_space<vmem>>, vector<1x1x16x16xf32>,
    %c1_i32_53 = arith.constant 1 : i32
    return
  }
  func.func @transform_0(%arg0: i32) -> (i32, i32, i32, i32) {
    %c0_i32 = arith.constant 0 : i32
    %c0_i32_0 = arith.constant 0 : i32
    %c0_i32_1 = arith.constant 0 : i32
    %c0_i32_2 = arith.constant 0 : i32
    return %arg0, %c0_i32, %c0_i32_0, %c0_i32_1 : i32, i32, i32, i32
  }
  func.func @transform_1(%arg0: i32) -> (i32, i32, i32) {
    %c0_i32 = arith.constant 0 : i32
    %c0_i32_0 = arith.constant 0 : i32
    %c0_i32_1 = arith.constant 0 : i32
    return %arg0, %c0_i32, %c0_i32_0 : i32, i32, i32
  }
  func.func @transform_2(%arg0: i32) -> (i32, i32, i32, i32) {
    %c0_i32 = arith.constant 0 : i32
    %c0_i32_0 = arith.constant 0 : i32
    %c0_i32_1 = arith.constant 0 : i32
    %c0_i32_2 = arith.constant 0 : i32
    return %arg0, %c0_i32, %c0_i32_0, %c0_i32_1 : i32, i32, i32, i32
  }
}

</mosaic_0001>

<bundles_post_ra>
// kernel: random_transform.1
= control target key start
LH: loop header
LB: loop body
LE: loop exit
PB: predicated region body
PF: predicated region fallthrough
CT: control target
= control target key end

     0   :  { %7 = vsyncpa [#allocation5], 0  ;;  %s1560_s0 = inlined_call_operand.hbm [shape: f32[2,4,16,16], index: 0, kind: input, shape index: {}]   ;;  %s1561_s1 = inlined_call_operand.vmem [shape: f32[2,2,16], index: 1, kind: input, shape index: {}]   ;;  %s1562_s2 = inlined_call_operand.hbm [shape: f32[2,4,16,16], index: 2, kind: output, shape index: {}]  }
   0x1   :  { %9 = vsyncpa [#allocation5 + $0x1], 0 }
   0x2   :  { %10 = vsyncpa [#allocation6], 0 }
   0x3   :  { %12 = vsyncpa [#allocation6 + $0x1], 0  ;;  %s1351_s9 = smov 0   ;;  %s1353_s10 = smov 0  }
   0x4   :  { %s1355_s11 = smov 0   ;;  %s1357_s12 = smov 0  }
   0x5 LB: > { %s1372_s13 = sadd.s32 4294967295, %s1328_s12   ;;  %s1015_s14 = sadd.s32 4294967294, %s1328_s12   ;;  %s1328_s12 = sphi %s1357_s12, %s1575_s12   ;;  %s1324_s11 = sphi %s1355_s11, %s1574_s11   ;;  %s1320_s10 = sphi %s1353_s10, %s1573_s10   ;;  %s1316_s9 = sphi %s1351_s9, %s1572_s9  }
   0x6   : > { %s1376_s15 = sadd.s32 1, %s1328_s12   ;;  %s25_s16 = sadd.s32 1, %s1324_s11 }
   0x7   : > { %s22_s17 = ssub.s32 %s1328_s12, %s1376_s15  ;;  %p32_p0 = scmp.ne.s32.totalorder %s1324_s11, %s1320_s10 }
   0x8   : > { %p23_p1 = scmp.eq.s32.totalorder %s22_s17, 0  ;;  %p33_p2 = scmp.eq.s32.totalorder %s1328_s12, 0 }
   0x9   : > { %p38_p3 = scmp.ne.s32.totalorder %s1320_s10, %s1316_s9  ;;  %p39_p4 = scmp.eq.s32.totalorder %s1372_s13, 0 }
   0xa   : > { %s1388_s18 = scalar_select %p23_p1, %s1324_s11, %s25_s16  }
   0xb   : > { %p1390_p5 = por %p33_p2, %p32_p0  ;;  %p1394_p6 = por %p39_p4, %p38_p3 }
   0xc   : > { %p88_p7 = scmp.eq.s32.totalorder %s1372_s13, 1  ;;  %p94_p8 = scmp.eq.s32.totalorder %s1015_s14, 1 }
   0xd   : > { %p1194_p10 = scmp.lt.s32.totalorder %s1328_s12, 2  ;;  %s114_s23 = sand.u32 1, %s1324_s11  }
   0xe   : > { %p1401_p11 = por %p88_p7, %p32_p0  ;;  %p1405_p12 = por %p94_p8, %p38_p3 }
   0xf   : > { %s1058_s24 = sshll.u32 %s1328_s12, 10  ;;  %s1018_s25 = sshll.u32 %s114_s23, 6 }
  0x10   : > { %s1566_s21 = scalar_select %p1401_p11, 1, 0 }
  0x11   : > { %s1567_s22 = scalar_select %p1405_p12, 1, 0 }
  0x12   : > { %s1414_s28 = scalar_lea.hbm %s1560_s0, %s1058_s24  ;;  %s118_s29 = scalar_lea.vmem [#allocation4], %s1018_s25 }
  0x13   : > { %s125_s30 = sshll.u32 %s118_s29, 4  ;;  %p1418_p13 = pnand %p1194_p10, %p1390_p5  ;;  %s1422_s30 = int_to_ptr.vmem [resolvable:$true] %s125_s30 }
  0x14   : > { %s1424_s4 = scalar_lea.sflag [#allocation5], %s114_s23  ;;  %s1232_s5 = scalar_lea.hbm %s1414_s28, 1024 }
  0x15   : > { %p1233_p0 = scmp.ne.s32.totalorder %s1414_s28, %s1232_s5  ;;  %p1234_p1 = pneg %p1418_p13 }
  0x16   : > { %s1237_s8 = scalar_lea.hbm %s1560_s0, 2048  ;;  %p1238_p4 = scmp.lt.u32.totalorder %s1414_s28, %s1560_s0 }
  0x17   : > { %p1235_p2 = pnand %p1234_p1, %p1233_p0  ;;  %p1239_p5 = scmp.lt.u32.totalorder %s1237_s8, %s1232_s5 }
  0x18   : > { %p1241_p8 = scmp.lt.u32.totalorder %s1232_s5, %s1414_s28 }
  0x19   : > { %p1236_p3 = pneg %p1235_p2  ;;  %p1240_p7 = por %p1239_p5, %p1238_p4 }
  0x1b   : > { %p1242_p10 = por %p1241_p8, %p1240_p7 }
  0x1d   : > { %p1243_p9 = pnand %p1242_p10, %p1236_p3 }
  0x1f   : > { %1246 = shalt.err (!%p1243_p9)
}
  0x20   : > { %s1247_s17 = scalar_lea.vmem %s1422_s30, 1024  ;;  %s1330_s19 = smov [#allocation4]  }
  0x21   : > { %p1248_p0 = scmp.ne.s32.totalorder %s1422_s30, %s1247_s17  ;;  %s1252_s23 = sshll.u32 %s1330_s19, 4  ;;  %s1253_s23 = int_to_ptr.vmem [resolvable:$false] %s1252_s23 }
  0x22   : > { %s1254_s24 = scalar_lea.vmem %s1253_s23, 2048  ;;  %p1255_p11 = scmp.lt.s32.totalorder %s1422_s30, %s1253_s23 }
  0x23   : > { %p1250_p2 = pnand %p1248_p0, %p1234_p1  ;;  %p1256_p4 = scmp.lt.s32.totalorder %s1254_s24, %s1247_s17 }
  0x25   : > { %p1251_p12 = pneg %p1250_p2  ;;  %p1257_p5 = por %p1256_p4, %p1255_p11 }
  0x27   : > { %p1258_p7 = pnand %p1257_p5, %p1251_p12 }
  0x29   : > { %1261 = shalt.err (!%p1258_p7)
}
  0x2a   : > { %s1331_s25 = smov 128   ;;  %s1332_s26 = smov 8  }
  0x2b   : > { %1189 = dma.hbm_to_vmem [thread:$0]  (!%p1418_p13), %s1414_s28, 1024, %s1422_s30, %s1424_s4, %s1331_s25, %s1331_s25, %s1332_s26  }
  0x2c   : > { %p1021_p9 = scmp.ge.s32.totalorder %s1328_s12, 1  ;;  %p140_p1 = scmp.lt.s32.totalorder %s1328_s12, 3 }
  0x2e   : > { %p141_p3 = pnand %p1021_p9, %p140_p1 }
  0x2f   : > { %s1455_s27 = sand.u32 (!%p141_p3), 1, %s1320_s10  }
  0x30   : > { %144 = sbr.rel (%p141_p3) target bundleno = 556 (0x22c), region = 28  ;;  %s1022_s29 = sshll.u32 (!%p141_p3), %s1455_s27, 6 }
  0x31   : > { %s147_s5 = scalar_lea.sflag (!%p141_p3), [#allocation5], %s1455_s27  ;;  %s1461_s6 = scalar_lea.vmem (!%p141_p3), [#allocation4], %s1022_s29 }
  0x37   : > { %1307 = dma.done.wait (%p1394_p6), %s147_s5, 1024  }
  0x38   : > { %1309 = vsyncadd (%p1394_p6), %s147_s5, 4294966272  ;;  %p175_p11 = scmp.lt.s32.totalorder %s1372_s13, 1  ;;  %vm224_vm0 = vcmask 130048   ;;  %v264_v1 = vld [vmem:[%s1461_s6] sm:$0xff]  ;;  %v186_v3 = vlaneseq  ;;  %v265_v31 = vld [vmem:[%s1461_s6 + $0x8] sm:$0xff]  ;;  %s174_s20 = scalar_lea.vmem [#allocation7], %s1022_s29 }
  0x39   : > { %1096 = vmatprep.mubr.msk.f32.mxu0 %vm224_vm0, %v264_v1  ;;  %v1029_v32 = vld [vmem:[%s1461_s6 + $0x10] sm:$0xff]  ;;  %v1030_v33 = vld [vmem:[%s1461_s6 + $0x18] sm:$0xff]  ;;  %v1037_v34 = vld [vmem:[%s1461_s6 + $0x20] sm:$0xff]  ;;  %s930_s8 = sshll.u32 %s174_s20, 4  ;;  %s1059_s14 = sshll.u32 %s1372_s13, 10  ;;  %s1508_s8 = int_to_ptr.vmem [resolvable:$true] %s930_s8 }
  0x3a   : > { %s176_s28 = scalar_select %p175_p11, %s1372_s13, 1  ;;  %v189_v6 = vshrl.u32 %v186_v3, 7  ;;  %v1038_v35 = vld [vmem:[%s1461_s6 + $0x28] sm:$0xff]  ;;  %v1045_v36 = vld [vmem:[%s1461_s6 + $0x30] sm:$0xff]  ;;  %v1046_v37 = vld [vmem:[%s1461_s6 + $0x38] sm:$0xff]  ;;  %v187_v38 = vand.u32 127, %v186_v3 }
  0x3b   : > { %s1514_s19 = scalar_lea.hbm %s1562_s2, %s1059_s14  ;;  %s917_s13 = scalar_lea.sflag [#allocation6], %s1455_s27 }
  0x3c   : > { %s1024_s30 = sshll.u32 %s176_s28, 1  ;;  %v190_v8 = vsub.s32 0, %v189_v6  ;;  %v232_v11 = vsub.s32 1, %v189_v6  ;;  %v229_v13 = vadd.s32 8, %v189_v6  ;;  %s1262_s23 = scalar_lea.vmem %s1508_s8, 1024 }
  0x3d   : > { %s178_s7 = scalar_lea.vmem %s1561_s1, %s1024_s30  ;;  %p1263_p6 = scmp.ne.s32.totalorder %s1508_s8, %s1262_s23 }
  0x3e   : > { %v179_v0 = vld [vmem:[%s178_s7] sm:$0x3]  ;;  %p1569_p12 = scmp.ne.s32.totalorder %s1566_s21, 0  ;;  %s1333_s24 = smov [#allocation7]  }
  0x3f   : > { %v180_v2 = vadd.f32 1.0, %v179_v0  ;;  %s1266_s25 = sshll.u32 %s1333_s24, 4  ;;  %s1267_s25 = int_to_ptr.vmem [resolvable:$false] %s1266_s25 }
  0x40   : > { %p1264_p13 = pnand %p1263_p6, %p1569_p12  ;;  %s1268_s26 = scalar_lea.vmem %s1267_s25, 2048 }
  0x41   : > { %v181_v4 = vmul.f32 0.5, %v180_v2  ;;  %p1269_p10 = scmp.lt.s32.totalorder %s1508_s8, %s1267_s25  ;;  %p1270_p0 = scmp.lt.s32.totalorder %s1268_s26, %s1262_s23 }
  0x42   : > { %p1265_p8 = pneg %p1264_p13 }
  0x43   : > { %v182_v5 = vmul.f32 15.0, %v181_v4  ;;  %p1271_p2 = por %p1270_p0, %p1269_p10 }
  0x45   : > { %v183_v7 = vfloor.f32 %v182_v5  ;;  %p1272_p4 = pnand %p1271_p2, %p1265_p8 }
  0x47   : > { %v184_v9 = vsub.f32 %v182_v5, %v183_v7  ;;  %v1180_v10 = vtrunc.f32 %v183_v7 }
  0x49   : > { %v1181_v12 = vcvt.f32.s32 %v1180_v10  ;;  %v236_v14 = vsub.f32 1.0, %v184_v9  ;;  %v204_v15 = vrot.slane %v184_v9, %v190_v8  ;;  %v253_v20 = vrot.slane %v184_v9, %v232_v11 }
  0x4b   : > { %v233_v16 = vrot.slane %v1181_v12, %v232_v11  ;;  %v240_v17 = vrot.slane %v236_v14, %v232_v11  ;;  %v243_v18 = vadd.s32 1, %v1181_v12  ;;  %v191_v19 = vrot.slane %v1181_v12, %v190_v8  ;;  %206 = vbcast.lane.b32.xlu1 %v204_v15, 256 }
  0x4d   : > { %vm234_vm1 = vcmp.eq.s32.totalorder %v189_v6, %v233_v16  ;;  %vm235_vm2 = vcmp.eq.s32.totalorder %v229_v13, %v233_v16  ;;  %v247_v21 = vrot.slane %v243_v18, %v232_v11  ;;  %193 = vbcast.lane.b32.xlu0 %v191_v19, 256 }
  0x4e   : > { %v241_v22 = vsel %vm234_vm1, %v240_v17, 0.0  ;;  %v242_v23 = vsel %vm235_vm2, %v240_v17, 0.0 }
  0x4f   : > { %vm248_vm3 = vcmp.eq.s32.totalorder %v189_v6, %v247_v21  ;;  %vm249_vm4 = vcmp.eq.s32.totalorder %v229_v13, %v247_v21  ;;  %210 = vbcast.lane.b32.xlu1 %v204_v15, 264 }
  0x50   : > { %v254_v24 = vsel %vm248_vm3, %v253_v20, 0.0  ;;  %v255_v25 = vsel %vm249_vm4, %v253_v20, 0.0 }
  0x51   : > { %v256_v26 = vadd.f32 %v254_v24, %v241_v22  ;;  %v257_v27 = vadd.f32 %v255_v25, %v242_v23  ;;  %197 = vbcast.lane.b32.xlu0 %v191_v19, 264 }
  0x53   : > { %258 = vst.msk [vmem:[#allocation3] sm:$0xff] %vm224_vm0, %v256_v26  ;;  %259 = vst.msk [vmem:[#allocation3 + $0x8] sm:$0xff] %vm224_vm0, %v257_v27 }
  0x5a   : > { %v262_v28 = vld [vmem:[#allocation3] sm:$0xff]  ;;  %v263_v29 = vld [vmem:[#allocation3 + $0x8] sm:$0xff] }
  0x5b   : > { %v1148_v30 = vpack.c.bf16 %v263_v29, %v262_v28 }
  0x5d   : > { %1149 = vmatprep.subr.bf16.mxu0 %v1148_v30 }
  0x5e   : > { %1151 = vmatpush3.bf16.msra.mxu0 %v1148_v30 }
  0x5f   : > { %1157 = vmatprep.subr.bf16.mxu0 %v1148_v30 }
  0x61   : > { %1097 = vmatmul.mubr.msk.f32.vlgmr.msra.gmra.mrb[0].mxu0 %vm224_vm0, %v265_v31 }
  0x62   : > { %1159 = vmatpush3.bf16.msra.mxu0 %v1148_v30  ;;  %1110 = vmatprep.mubr.msk.f32.mxu0 %vm224_vm0, %v1029_v32 }
  0x63   : > { %1165 = vmatprep.subr.bf16.mxu0 %v1148_v30 }
  0x65   : > { %1111 = vmatmul.mubr.msk.f32.vlgmr.msra.gmra.mrb[2].mxu0 %vm224_vm0, %v1030_v33 }
  0x66   : > { %1167 = vmatpush3.bf16.msra.mxu0 %v1148_v30  ;;  %1124 = vmatprep.mubr.msk.f32.mxu0 %vm224_vm0, %v1037_v34 }
  0x67   : > { %1173 = vmatprep.subr.bf16.mxu0 %v1148_v30 }
  0x69   : > { %1125 = vmatmul.mubr.msk.f32.vlgmr.msra.gmra.mrb[4].mxu0 %vm224_vm0, %v1038_v35 }
  0x6a   : > { %1175 = vmatpush3.bf16.msra.mxu0 %v1148_v30  ;;  %1138 = vmatprep.mubr.msk.f32.mxu0 %vm224_vm0, %v1045_v36 }
  0x6d   : > { %1139 = vmatmul.mubr.msk.f32.vlgmr.msra.gmra.mrb[6].mxu0 %vm224_vm0, %v1046_v37 }
  0xbd   : > { %v207_v39 = vpop.permute.xlu1 %206 }
  0xbe   : > { %v212_v40 = vsub.f32 1.0, %v207_v39 }
  0xbf   : > { %v194_v41 = vpop.permute.xlu0 %193 }
  0xc0   : > { %vm199_vm5 = vcmp.eq.s32.totalorder %v187_v38, %v194_v41  ;;  %v216_v42 = vadd.s32 1, %v194_v41 }
  0xc1   : > { %v214_v43 = vsel %vm199_vm5, %v212_v40, 0.0  ;;  %v211_v44 = vpop.permute.xlu1 %210 }
  0xc2   : > { %vm218_vm6 = vcmp.eq.s32.totalorder %v187_v38, %v216_v42  ;;  %v213_v45 = vsub.f32 1.0, %v211_v44 }
  0xc3   : > { %v220_v46 = vsel %vm218_vm6, %v207_v39, 0.0  ;;  %v198_v47 = vpop.permute.xlu0 %197 }
  0xc4   : > { %v222_v48 = vadd.f32 %v220_v46, %v214_v43  ;;  %vm200_vm7 = vcmp.eq.s32.totalorder %v187_v38, %v198_v47  ;;  %v217_v49 = vadd.s32 1, %v198_v47 }
  0xc5   : > { %v215_v50 = vsel %vm200_vm7, %v213_v45, 0.0 }
  0xc6   : > { %225 = vst.msk [vmem:[#allocation2] sm:$0xff] %vm224_vm0, %v222_v48  ;;  %vm219_vm8 = vcmp.eq.s32.totalorder %v187_v38, %v217_v49 }
  0xc7   : > { %v221_v51 = vsel %vm219_vm8, %v211_v44, 0.0 }
  0xc8   : > { %v223_v52 = vadd.f32 %v221_v51, %v215_v50 }
  0xca   : > { %226 = vst.msk [vmem:[#allocation2 + $0x8] sm:$0xff] %vm224_vm0, %v223_v52 }
  0xcd   : > { %v260_v53 = vld [vmem:[#allocation2] sm:$0xff] }
  0xce   : > { %1103 = vmatprep.mubr.msk.f32.mxu1 %vm224_vm0, %v260_v53 }
  0xd1   : > { %v261_v60 = vld [vmem:[#allocation2 + $0x8] sm:$0xff] }
 0x134   : > { %v1098_v54 = vpop.f32.mrb[0].mxu0 }
 0x135   : > { %v338_v55 = vpop.f32.mrb[1].mxu0 }
 0x136   : > { %v1152_v56 = vpack.c.bf16 %v1098_v54, %v338_v55 }
 0x138   : > { %1153 = vmatprep.subr.bf16.mxu1 %v1152_v56  ;;  %v1112_v57 = vpop.f32.mrb[2].mxu0 }
 0x139   : > { %1155 = vmatpush3.bf16.msra.mxu1 %v1152_v56  ;;  %v505_v58 = vpop.f32.mrb[3].mxu0 }
 0x13a   : > { %v1160_v59 = vpack.c.bf16 %v1112_v57, %v505_v58 }
 0x13c   : > { %1104 = vmatmul.mubr.msk.f32.vlgmr.msra.gmra.mrb[0].mxu1 %vm224_vm0, %v261_v60  ;;  %1161 = vmatprep.subr.bf16.mxu1 %v1160_v59  ;;  %v1126_v61 = vpop.f32.mrb[4].mxu0 }
 0x13d   : > { %1163 = vmatpush3.bf16.msra.mxu1 %v1160_v59  ;;  %1117 = vmatprep.mubr.msk.f32.mxu1 %vm224_vm0, %v260_v53  ;;  %v667_v62 = vpop.f32.mrb[5].mxu0 }
 0x13e   : > { %v1168_v63 = vpack.c.bf16 %v1126_v61, %v667_v62 }
 0x140   : > { %1118 = vmatmul.mubr.msk.f32.vlgmr.msra.gmra.mrb[2].mxu1 %vm224_vm0, %v261_v60  ;;  %1169 = vmatprep.subr.bf16.mxu1 %v1168_v63  ;;  %v1140_v0 = vpop.f32.mrb[6].mxu0 }
 0x141   : > { %1171 = vmatpush3.bf16.msra.mxu1 %v1168_v63  ;;  %1131 = vmatprep.mubr.msk.f32.mxu1 %vm224_vm0, %v260_v53  ;;  %v829_v1 = vpop.f32.mrb[7].mxu0 }
 0x142   : > { %v1176_v2 = vpack.c.bf16 %v1140_v0, %v829_v1 }
 0x144   : > { %1132 = vmatmul.mubr.msk.f32.vlgmr.msra.gmra.mrb[4].mxu1 %vm224_vm0, %v261_v60  ;;  %1177 = vmatprep.subr.bf16.mxu1 %v1176_v2 }
 0x145   : > { %1179 = vmatpush3.bf16.msra.mxu1 %v1176_v2  ;;  %1145 = vmatprep.mubr.msk.f32.mxu1 %vm224_vm0, %v260_v53 }
 0x148   : > { %1146 = vmatmul.mubr.msk.f32.vlgmr.msra.gmra.mrb[6].mxu1 %vm224_vm0, %v261_v60 }
 0x20f   : > { %v1105_v3 = vpop.f32.mrb[0].mxu1 }
 0x210   : > { %429 = vst.msk [vmem:[%s174_s20 + $0x8] sm:$0xff] %vm224_vm0, %v1105_v3  ;;  %v419_v4 = vpop.f32.mrb[1].mxu1 }
 0x211   : > { %428 = vst.msk [vmem:[%s174_s20] sm:$0xff] %vm224_vm0, %v419_v4 }
 0x213   : > { %v1119_v5 = vpop.f32.mrb[2].mxu1 }
 0x214   : > { %1036 = vst.msk [vmem:[%s174_s20 + $0x18] sm:$0xff] %vm224_vm0, %v1119_v5  ;;  %v580_v6 = vpop.f32.mrb[3].mxu1 }
 0x215   : > { %1035 = vst.msk [vmem:[%s174_s20 + $0x10] sm:$0xff] %vm224_vm0, %v580_v6 }
 0x217   : > { %v1133_v7 = vpop.f32.mrb[4].mxu1 }
 0x218   : > { %1044 = vst.msk [vmem:[%s174_s20 + $0x28] sm:$0xff] %vm224_vm0, %v1133_v7  ;;  %v742_v8 = vpop.f32.mrb[5].mxu1 }
 0x219   : > { %1043 = vst.msk [vmem:[%s174_s20 + $0x20] sm:$0xff] %vm224_vm0, %v742_v8 }
 0x21b   : > { %v1147_v9 = vpop.f32.mrb[6].mxu1 }
 0x21c   : > { %1052 = vst.msk [vmem:[%s174_s20 + $0x38] sm:$0xff] %vm224_vm0, %v1147_v9  ;;  %v904_v10 = vpop.f32.mrb[7].mxu1 }
 0x21d   : > { %1051 = vst.msk [vmem:[%s174_s20 + $0x30] sm:$0xff] %vm224_vm0, %v904_v10 }
 0x21e   : > { %1275 = shalt.err (!%p1272_p4)
}
 0x21f   : > { %s1276_s29 = scalar_lea.hbm %s1514_s19, 1024  ;;  %s1280_s28 = scalar_lea.hbm %s1562_s2, 2048 }
 0x220   : > { %p1277_p5 = scmp.ne.s32.totalorder %s1514_s19, %s1276_s29  ;;  %p1281_p1 = scmp.lt.u32.totalorder %s1514_s19, %s1562_s2 }
 0x221   : > { %p1282_p3 = scmp.lt.u32.totalorder %s1280_s28, %s1276_s29  ;;  %p1284_p6 = scmp.lt.u32.totalorder %s1276_s29, %s1514_s19 }
 0x222   : > { %p1278_p7 = pnand %p1277_p5, %p1569_p12 }
 0x223   : > { %p1283_p11 = por %p1282_p3, %p1281_p1 }
 0x224   : > { %p1279_p9 = pneg %p1278_p7 }
 0x225   : > { %p1285_p13 = por %p1284_p6, %p1283_p11 }
 0x227   : > { %p1286_p8 = pnand %p1285_p13, %p1279_p9 }
 0x229   : > { %1289 = shalt.err (!%p1286_p8)
}
 0x22a   : > { %s1334_s4 = smov 128   ;;  %s1335_s7 = smov 8  }
 0x22b   : > { %1184 = dma.vmem_to_hbm [thread:$0]  (%p1569_p12), %s1508_s8, 1024, %s1514_s19, %s917_s13, %s1334_s4, %s1334_s4, %s1335_s7  }
 0x22c PF: > { %s945_s20 = sand.u32 1, %s1316_s9   ;;  %p1570_p10 = scmp.ne.s32.totalorder %s1567_s22, 0 }
 0x22d   : > { %p1571_p0 = scmp.ge.s32.totalorder %s1328_s12, 2  ;;  %s946_s14 = scalar_lea.sflag [#allocation6], %s945_s20 }
 0x22f   : > { %p1191_p2 = pnand %p1571_p0, %p1570_p10 }
 0x231   : > { %1311 = dma.done.wait (!%p1191_p2), %s946_s14, 1024  }
 0x232   : > { %1313 = vsyncadd (!%p1191_p2), %s946_s14, 4294966272  ;;  %p15_p4 = scmp.ge.s32.totalorder %s1376_s15, 4   ;;  %s1572_s9 = smov %s1320_s10 }
 0x233   : > { %s1573_s10 = smov %s1324_s11  ;;  %s1574_s11 = smov %s1388_s18 }
 0x234   : > { %s1575_s12 = smov %s1376_s15  ;;  %17 = sbr.rel (!%p15_p4) target bundleno = 5 (0x5), region = 82 }
 0x23b   :  { %951 = vsyncpa [#allocation5], 1 }
 0x23c   :  { %953 = vsyncpa [#allocation5 + $0x1], 1 }
 0x23d   :  { %954 = vsyncpa [#allocation6], 1 }
 0x23e   :  { %956 = vsyncpa [#allocation6 + $0x1], 1 }

</bundles_post_ra>
